<compile_context>
chip_gen: v7x
topology: tpu7x:2x2x1
jax: 0.10.0
libtpu: 0.0.40
codegen_flags: <defaults>
</compile_context>

<pallas_src>
import functools

import jax
import jax.numpy as jnp
from jax.experimental import pallas as pl
from jax.experimental.pallas import tpu as pltpu

IN_FEATURES = 28 * 28   # 784
OUT_FEATURES = 10
K_PAD = 896             # 7 * 128 : lane-aligned contraction dim
N_PAD = 128             # lane-dense output dim
DEFAULT_TB = 512        # batch tile (>=512 rows amortizes ~0.35us per grid step)


def linear_kernel(x_ref, w_ref, b_ref, o_ref):
    # x_ref: (TB, K_PAD)  w_ref: (K_PAD, N_PAD)  b_ref: (1, N_PAD)  o_ref: (TB, N_PAD)
    acc = jnp.dot(x_ref[...], w_ref[...], preferred_element_type=jnp.float32)
    o_ref[...] = (acc + b_ref[...]).astype(o_ref.dtype)


def _round_up(n, m):
    return ((n + m - 1) // m) * m


@functools.partial(jax.jit, static_argnames=("tb",))
def simple_net_forward(x, w, b, tb=DEFAULT_TB):
    """x: (B, 784) f32, w: (10, 784) f32 (PyTorch layout), b: (10,) f32 -> (B, 10) f32."""
    B = x.shape[0]

    # Effective batch tile: big for throughput, but no larger than the (8-aligned)
    # batch for tiny inputs. B is padded to a multiple of the tile (exact math,
    # padded rows are discarded on the way out).
    tb_eff = min(tb, _round_up(B, 8))
    b_pad = _round_up(B, tb_eff)

    # Zero-pad to lane-aligned shapes. Padding K with zeros is exact; padded
    # output columns / rows are sliced away below.
    x_p = jnp.zeros((b_pad, K_PAD), x.dtype).at[:B, :IN_FEATURES].set(x)
    w_t = jnp.zeros((K_PAD, N_PAD), w.dtype).at[:IN_FEATURES, :OUT_FEATURES].set(w.T)
    b_p = jnp.zeros((1, N_PAD), b.dtype).at[0, :OUT_FEATURES].set(b)

    grid = (b_pad // tb_eff,)

    out = pl.pallas_call(
        linear_kernel,
        out_shape=jax.ShapeDtypeStruct((b_pad, N_PAD), jnp.float32),
        grid_spec=pltpu.PrefetchScalarGridSpec(
            num_scalar_prefetch=0,
            grid=grid,
            in_specs=[
                pl.BlockSpec((tb_eff, K_PAD), lambda i: (i, 0)),  # x: pipelined batch tiles
                pl.BlockSpec((K_PAD, N_PAD), lambda i: (0, 0)),   # weight: resident
                pl.BlockSpec((1, N_PAD), lambda i: (0, 0)),       # bias: resident
            ],
            out_specs=pl.BlockSpec((tb_eff, N_PAD), lambda i: (i, 0)),
        ),
        compiler_params=pltpu.CompilerParams(
            dimension_semantics=("parallel",),  # batch tiles independent (v7x: 2 TCs)
        ),
        cost_estimate=pl.CostEstimate(
            flops=2 * B * IN_FEATURES * OUT_FEATURES,
            bytes_accessed=(B * IN_FEATURES * 4
                            + IN_FEATURES * OUT_FEATURES * 4
                            + B * OUT_FEATURES * 4),
            transcendentals=0,
        ),
    )(x_p, w_t, b_p)

    return out[:B, :OUT_FEATURES]


def init_params(key):
    # Deterministic init mimicking nn.Linear(784, 10): U(-1/sqrt(784), 1/sqrt(784)).
    k_w, k_b = jax.random.split(key)
    bound = 1.0 / jnp.sqrt(784.0)
    w = jax.random.uniform(k_w, (OUT_FEATURES, IN_FEATURES), jnp.float32, -bound, bound)
    b = jax.random.uniform(k_b, (OUT_FEATURES,), jnp.float32, -bound, bound)
    return w, b


if __name__ == "__main__":
    key = jax.random.PRNGKey(0)
    k_x, k_p = jax.random.split(key)

    batch = 2
    x = jax.random.normal(k_x, (batch, IN_FEATURES), jnp.float32)  # flattened MNIST-style input
    w, b = init_params(k_p)

    out = simple_net_forward(x, w, b)
    out = jax.block_until_ready(out)

    # Reference check in plain JAX (same math as torch's F.linear): x @ W^T + b.
    ref = x @ w.T + b
    assert out.shape == (batch, OUT_FEATURES)
    assert jnp.allclose(out, ref, atol=1e-5, rtol=1e-5)

    print("KERNEL_OK")
</pallas_src>

<mosaic_0001>
module attributes {stable_mosaic.version = 11 : i64} {
  func.func @linear_kernel(%arg0: i32, %arg1: memref<8x896xf32, #tpu.memory_space<vmem>>, %arg2: memref<896x128xf32, #tpu.memory_space<vmem>>, %arg3: memref<1x128xf32, #tpu.memory_space<vmem>>, %arg4: memref<8x128xf32, #tpu.memory_space<vmem>>) attributes {dimension_semantics = [#tpu.dimension_semantics<parallel>], iteration_bounds = array<i64: 1>, scalar_prefetch = 0 : i64, scratch_operands = 0 : i64, tpu.core_type = #tpu.core_type<tc>, window_params = [{transform_indices = @transform_0, window_bounds = array<i64: 8, 896>}, {pipeline_mode = #tpu.pipeline_mode<synchronous>, transform_indices = @transform_1, window_bounds = array<i64: 896, 128>}, {pipeline_mode = #tpu.pipeline_mode<synchronous>, transform_indices = @transform_2, window_bounds = array<i64: 1, 128>}, {transform_indices = @transform_3, window_bounds = array<i64: 8, 128>}]} {
    %c0 = arith.constant 0 : index
    %c0_0 = arith.constant 0 : index
    %0 = vector.load %arg1[%c0, %c0_0] : memref<8x896xf32, #tpu.memory_space<vmem>>, vector<8x896xf32>
    %c0_1 = arith.constant 0 : index
    %c0_2 = arith.constant 0 : index
    %1 = vector.load %arg2[%c0_1, %c0_2] : memref<896x128xf32, #tpu.memory_space<vmem>>, vector<896x128xf32>
    %cst = arith.constant dense<0.000000e+00> : vector<8x128xf32>
    %2 = tpu.matmul %0, %1, %cst {dimension_numbers = #tpu.dot_dimension_numbers<[1], [0], [0], [1], [0, 0, 1, 1], [], []>} : vector<8x896xf32>, vector<896x128xf32>, vector<8x128xf32> -> vector<8x128xf32>
    %c0_3 = arith.constant 0 : index
    %c0_4 = arith.constant 0 : index
    %3 = vector.load %arg3[%c0_3, %c0_4] : memref<1x128xf32, #tpu.memory_space<vmem>>, vector<1x128xf32>
    %4 = vector.broadcast %3 : vector<1x128xf32> to vector<8x128xf32>
    %5 = arith.addf %2, %4 : vector<8x128xf32>
    %c0_5 = arith.constant 0 : index
    %c0_6 = arith.constant 0 : index
    %6 = vector.load %arg4[%c0_5, %c0_6] : memref<8x128xf32, #tpu.memory_space<vmem>>, vector<8x128xf32>
    tpu.vector_store %arg4[%c0_5, %c0_6], %5 {strides = array<i32>} : memref<8x128xf32, #tpu.memory_space<vmem>>, vector<8x128xf32>,
    return
  }
  func.func @transform_0(%arg0: i32) -> (i32, i32) {
    %c0_i32 = arith.constant 0 : i32
    %c0_i32_0 = arith.constant 0 : i32
    return %arg0, %c0_i32 : i32, i32
  }
  func.func @transform_1(%arg0: i32) -> (i32, i32) {
    %c0_i32 = arith.constant 0 : i32
    %c0_i32_0 = arith.constant 0 : i32
    %c0_i32_1 = arith.constant 0 : i32
    return %c0_i32, %c0_i32_0 : i32, i32
  }
  func.func @transform_2(%arg0: i32) -> (i32, i32) {
    %c0_i32 = arith.constant 0 : i32
    %c0_i32_0 = arith.constant 0 : i32
    %c0_i32_1 = arith.constant 0 : i32
    return %c0_i32, %c0_i32_0 : i32, i32
  }
  func.func @transform_3(%arg0: i32) -> (i32, i32) {
    %c0_i32 = arith.constant 0 : i32
    %c0_i32_0 = arith.constant 0 : i32
    return %arg0, %c0_i32 : i32, i32
  }
}

</mosaic_0001>

<bundles_post_ra>
// kernel: simple_net_forward.1
= control target key start
LH: loop header
LB: loop body
LE: loop exit
PB: predicated region body
PF: predicated region fallthrough
CT: control target
= control target key end

     0   :  { %vm707_vm0 = vmmov 0   ;;  %s1100_s1 = inlined_call_operand.vmem [shape: f32[896,128], index: 1, kind: input, shape index: {}]   ;;  %s1101_s0 = inlined_call_operand.vmem [shape: f32[8,896], index: 0, kind: input, shape index: {}]   ;;  %s1102_s2 = inlined_call_operand.vmem [shape: f32[1,128], index: 2, kind: input, shape index: {}]   ;;  %s1103_s3 = inlined_call_operand.vmem [shape: f32[8,128], index: 3, kind: output, shape index: {}]  }
   0x1   :  { %v37_v0 = vld [vmem:[%s1100_s1 + $0x80] sm:$0xff]  ;;  %v38_v1 = vld [vmem:[%s1100_s1 + $0x88] sm:$0xff]  ;;  %v39_v11 = vld [vmem:[%s1100_s1 + $0x90] sm:$0xff] }
   0x2   :  { %v21_v2 = vld [vmem:[%s1100_s1] sm:$0xff]  ;;  %v583_v3 = vpack.c.bf16 %v38_v1, %v37_v0  ;;  %v22_v4 = vld [vmem:[%s1100_s1 + $0x8] sm:$0xff]  ;;  %v40_v13 = vld [vmem:[%s1100_s1 + $0x98] sm:$0xff] }
   0x3   :  { %v69_v5 = vld [vmem:[%s1100_s1 + $0x180] sm:$0xff]  ;;  %v70_v6 = vld [vmem:[%s1100_s1 + $0x188] sm:$0xff]  ;;  %v585_v7 = vpack.c.bf16 %v22_v4, %v21_v2  ;;  %v23_v14 = vld [vmem:[%s1100_s1 + $0x10] sm:$0xff]  ;;  %v587_v16 = vpack.c.bf16 %v40_v13, %v39_v11 }
   0x4   :  { %v615_v8 = vpack.c.bf16 %v70_v6, %v69_v5  ;;  %v53_v9 = vld [vmem:[%s1100_s1 + $0x100] sm:$0xff]  ;;  %v54_v10 = vld [vmem:[%s1100_s1 + $0x108] sm:$0xff]  ;;  %584 = vmatprep.subr.bf16.mxu0 %v583_v3  ;;  %v24_v15 = vld [vmem:[%s1100_s1 + $0x18] sm:$0xff] }
   0x5   :  { %v617_v12 = vpack.c.bf16 %v54_v10, %v53_v9  ;;  %586 = vmatpush3.bf16.msra.mxu0 %v585_v7  ;;  %v589_v17 = vpack.c.bf16 %v24_v15, %v23_v14  ;;  %v71_v18 = vld [vmem:[%s1100_s1 + $0x190] sm:$0xff]  ;;  %v72_v19 = vld [vmem:[%s1100_s1 + $0x198] sm:$0xff]  ;;  %v41_v23 = vld [vmem:[%s1100_s1 + $0xa0] sm:$0xff] }
   0x6   :  { %616 = vmatprep.subr.bf16.mxu1 %v615_v8  ;;  %v55_v20 = vld [vmem:[%s1100_s1 + $0x110] sm:$0xff]  ;;  %v619_v21 = vpack.c.bf16 %v72_v19, %v71_v18  ;;  %v56_v22 = vld [vmem:[%s1100_s1 + $0x118] sm:$0xff]  ;;  %v42_v24 = vld [vmem:[%s1100_s1 + $0xa8] sm:$0xff]  ;;  %588 = vmatprep.subr.bf16.mxu0 %v587_v16 }
   0x7   :  { %618 = vmatpush3.bf16.msra.mxu1 %v617_v12  ;;  %v621_v25 = vpack.c.bf16 %v56_v22, %v55_v20  ;;  %v591_v26 = vpack.c.bf16 %v42_v24, %v41_v23  ;;  %v25_v27 = vld [vmem:[%s1100_s1 + $0x20] sm:$0xff]  ;;  %v26_v28 = vld [vmem:[%s1100_s1 + $0x28] sm:$0xff]  ;;  %v43_v35 = vld [vmem:[%s1100_s1 + $0xb0] sm:$0xff] }
   0x8   :  { %v73_v29 = vld [vmem:[%s1100_s1 + $0x1a0] sm:$0xff]  ;;  %620 = vmatprep.subr.bf16.mxu1 %v619_v21  ;;  %v74_v30 = vld [vmem:[%s1100_s1 + $0x1a8] sm:$0xff]  ;;  %v593_v33 = vpack.c.bf16 %v26_v28, %v25_v27  ;;  %v44_v36 = vld [vmem:[%s1100_s1 + $0xb8] sm:$0xff] }
   0x9   :  { %v57_v31 = vld [vmem:[%s1100_s1 + $0x120] sm:$0xff]  ;;  %v58_v32 = vld [vmem:[%s1100_s1 + $0x128] sm:$0xff]  ;;  %590 = vmatpush3.bf16.msra.mxu0 %v589_v17  ;;  %v623_v34 = vpack.c.bf16 %v74_v30, %v73_v29  ;;  %v27_v37 = vld [vmem:[%s1100_s1 + $0x30] sm:$0xff]  ;;  %v595_v39 = vpack.c.bf16 %v44_v36, %v43_v35 }
   0xa   :  { %592 = vmatprep.subr.bf16.mxu0 %v591_v26  ;;  %v625_v38 = vpack.c.bf16 %v58_v32, %v57_v31  ;;  %v28_v40 = vld [vmem:[%s1100_s1 + $0x38] sm:$0xff]  ;;  %v75_v41 = vld [vmem:[%s1100_s1 + $0x1b0] sm:$0xff]  ;;  %v45_v46 = vld [vmem:[%s1100_s1 + $0xc0] sm:$0xff] }
   0xb   :  { %622 = vmatpush3.bf16.msra.mxu1 %v621_v25  ;;  %v76_v42 = vld [vmem:[%s1100_s1 + $0x1b8] sm:$0xff]  ;;  %v59_v44 = vld [vmem:[%s1100_s1 + $0x130] sm:$0xff]  ;;  %v46_v47 = vld [vmem:[%s1100_s1 + $0xc8] sm:$0xff]  ;;  %v597_v48 = vpack.c.bf16 %v28_v40, %v27_v37 }
   0xc   :  { %624 = vmatprep.subr.bf16.mxu1 %v623_v34  ;;  %v627_v43 = vpack.c.bf16 %v76_v42, %v75_v41  ;;  %v60_v45 = vld [vmem:[%s1100_s1 + $0x138] sm:$0xff]  ;;  %v77_v49 = vld [vmem:[%s1100_s1 + $0x1c0] sm:$0xff]  ;;  %v78_v50 = vld [vmem:[%s1100_s1 + $0x1c8] sm:$0xff]  ;;  %v599_v52 = vpack.c.bf16 %v46_v47, %v45_v46 }
   0xd   :  { %594 = vmatpush3.bf16.msra.mxu0 %v593_v33  ;;  %v629_v51 = vpack.c.bf16 %v60_v45, %v59_v44  ;;  %v29_v53 = vld [vmem:[%s1100_s1 + $0x40] sm:$0xff]  ;;  %v30_v54 = vld [vmem:[%s1100_s1 + $0x48] sm:$0xff]  ;;  %v631_v56 = vpack.c.bf16 %v78_v50, %v77_v49  ;;  %v47_v58 = vld [vmem:[%s1100_s1 + $0xd0] sm:$0xff] }
   0xe   :  { %596 = vmatprep.subr.bf16.mxu0 %v595_v39  ;;  %v61_v55 = vld [vmem:[%s1100_s1 + $0x140] sm:$0xff]  ;;  %v62_v57 = vld [vmem:[%s1100_s1 + $0x148] sm:$0xff]  ;;  %v48_v59 = vld [vmem:[%s1100_s1 + $0xd8] sm:$0xff]  ;;  %v601_v62 = vpack.c.bf16 %v30_v54, %v29_v53 }
   0xf   :  { %626 = vmatpush3.bf16.msra.mxu1 %v625_v38  ;;  %v79_v60 = vld [vmem:[%s1100_s1 + $0x1d0] sm:$0xff]  ;;  %v80_v61 = vld [vmem:[%s1100_s1 + $0x1d8] sm:$0xff]  ;;  %v633_v63 = vpack.c.bf16 %v62_v57, %v61_v55  ;;  %v603_v0 = vpack.c.bf16 %v48_v59, %v47_v58  ;;  %v49_v6 = vld [vmem:[%s1100_s1 + $0xe0] sm:$0xff] }
  0x10   :  { %628 = vmatprep.subr.bf16.mxu1 %v627_v43  ;;  %v31_v1 = vld [vmem:[%s1100_s1 + $0x50] sm:$0xff]  ;;  %v32_v2 = vld [vmem:[%s1100_s1 + $0x58] sm:$0xff]  ;;  %v635_v4 = vpack.c.bf16 %v80_v61, %v79_v60  ;;  %v50_v7 = vld [vmem:[%s1100_s1 + $0xe8] sm:$0xff] }
  0x11   :  { %598 = vmatpush3.bf16.msra.mxu0 %v597_v48  ;;  %v63_v3 = vld [vmem:[%s1100_s1 + $0x150] sm:$0xff]  ;;  %v64_v5 = vld [vmem:[%s1100_s1 + $0x158] sm:$0xff]  ;;  %v81_v8 = vld [vmem:[%s1100_s1 + $0x1e0] sm:$0xff]  ;;  %v605_v10 = vpack.c.bf16 %v32_v2, %v31_v1  ;;  %v607_v14 = vpack.c.bf16 %v50_v7, %v49_v6  ;;  %v708_v1 = vmov 0.0  }
  0x12   :  { %600 = vmatprep.subr.bf16.mxu0 %v599_v52  ;;  %v82_v9 = vld [vmem:[%s1100_s1 + $0x1e8] sm:$0xff]  ;;  %v33_v11 = vld [vmem:[%s1100_s1 + $0x60] sm:$0xff]  ;;  %v637_v13 = vpack.c.bf16 %v64_v5, %v63_v3  ;;  %v51_v19 = vld [vmem:[%s1100_s1 + $0xf0] sm:$0xff] }
  0x13   :  { %630 = vmatpush3.bf16.msra.mxu1 %v629_v51  ;;  %v15_v12 = vld [vmem:[%s1101_s0 + $0x8] sm:$0xff]  ;;  %v65_v16 = vld [vmem:[%s1100_s1 + $0x160] sm:$0xff]  ;;  %v639_v18 = vpack.c.bf16 %v82_v9, %v81_v8  ;;  %v52_v20 = vld [vmem:[%s1100_s1 + $0xf8] sm:$0xff]  ;;  %v706_v51 = vmov 0.0|0.0  }
  0x14   :  { %632 = vmatprep.subr.bf16.mxu1 %v631_v56  ;;  %v34_v15 = vld [vmem:[%s1100_s1 + $0x68] sm:$0xff]  ;;  %204 = vmatprep.mubr.f32.mxu0 %v15_v12  ;;  %v17_v21 = vld [vmem:[%s1101_s0 + $0x18] sm:$0xff]  ;;  %v83_v22 = vld [vmem:[%s1100_s1 + $0x1f0] sm:$0xff]  ;;  %v611_v26 = vpack.c.bf16 %v52_v20, %v51_v19 }
  0x15   :  { %602 = vmatpush3.bf16.msra.mxu0 %v601_v62  ;;  %v66_v17 = vld [vmem:[%s1100_s1 + $0x168] sm:$0xff]  ;;  %v84_v23 = vld [vmem:[%s1100_s1 + $0x1f8] sm:$0xff]  ;;  %274 = vmatprep.mubr.f32.mxu1 %v17_v21  ;;  %v609_v24 = vpack.c.bf16 %v34_v15, %v33_v11  ;;  %v35_v27 = vld [vmem:[%s1100_s1 + $0x70] sm:$0xff] }
  0x16   :  { %604 = vmatprep.subr.bf16.mxu0 %v603_v0  ;;  %v641_v25 = vpack.c.bf16 %v66_v17, %v65_v16  ;;  %v36_v28 = vld [vmem:[%s1100_s1 + $0x78] sm:$0xff]  ;;  %v67_v29 = vld [vmem:[%s1100_s1 + $0x170] sm:$0xff]  ;;  %v643_v30 = vpack.c.bf16 %v84_v23, %v83_v22  ;;  %v101_v32 = vld [vmem:[%s1100_s1 + $0x280] sm:$0xff] }
  0x17   :  { %634 = vmatpush3.bf16.msra.mxu1 %v633_v63  ;;  %v68_v31 = vld [vmem:[%s1100_s1 + $0x178] sm:$0xff]  ;;  %v102_v33 = vld [vmem:[%s1100_s1 + $0x288] sm:$0xff]  ;;  %v613_v34 = vpack.c.bf16 %v36_v28, %v35_v27  ;;  %v85_v37 = vld [vmem:[%s1100_s1 + $0x200] sm:$0xff] }
  0x18   :  { %636 = vmatprep.subr.bf16.mxu1 %v635_v4  ;;  %v645_v35 = vpack.c.bf16 %v68_v31, %v67_v29  ;;  %v647_v36 = vpack.c.bf16 %v102_v33, %v101_v32  ;;  %v86_v38 = vld [vmem:[%s1100_s1 + $0x208] sm:$0xff]  ;;  %v103_v39 = vld [vmem:[%s1100_s1 + $0x290] sm:$0xff]  ;;  %v104_v40 = vld [vmem:[%s1100_s1 + $0x298] sm:$0xff] }
  0x19   :  { %606 = vmatpush3.bf16.msra.mxu0 %v605_v10  ;;  %v117_v41 = vld [vmem:[%s1100_s1 + $0x300] sm:$0xff]  ;;  %v118_v42 = vld [vmem:[%s1100_s1 + $0x308] sm:$0xff]  ;;  %v649_v44 = vpack.c.bf16 %v86_v38, %v85_v37  ;;  %v16_v45 = vld [vmem:[%s1101_s0 + $0x10] sm:$0xff]  ;;  %v651_v46 = vpack.c.bf16 %v104_v40, %v103_v39 }
  0x1a   :  { %608 = vmatprep.subr.bf16.mxu0 %v607_v14  ;;  %v14_v43 = vld [vmem:[%s1101_s0] sm:$0xff]  ;;  %v87_v47 = vld [vmem:[%s1100_s1 + $0x210] sm:$0xff]  ;;  %v88_v48 = vld [vmem:[%s1100_s1 + $0x218] sm:$0xff]  ;;  %v680_v49 = vpack.c.bf16 %v118_v42, %v117_v41 }
  0x1b   :  { %638 = vmatpush3.bf16.msra.mxu1 %v637_v13  ;;  %v105_v50 = vld [vmem:[%s1100_s1 + $0x2a0] sm:$0xff]  ;;  %v106_v52 = vld [vmem:[%s1100_s1 + $0x2a8] sm:$0xff]  ;;  %v119_v53 = vld [vmem:[%s1100_s1 + $0x310] sm:$0xff]  ;;  %v653_v55 = vpack.c.bf16 %v88_v48, %v87_v47 }
  0x1c   :  { %640 = vmatprep.subr.bf16.mxu1 %v639_v18  ;;  %v120_v54 = vld [vmem:[%s1100_s1 + $0x318] sm:$0xff]  ;;  %v89_v56 = vld [vmem:[%s1100_s1 + $0x220] sm:$0xff]  ;;  %v655_v57 = vpack.c.bf16 %v106_v52, %v105_v50  ;;  %v90_v58 = vld [vmem:[%s1100_s1 + $0x228] sm:$0xff] }
  0x1d   :  { %610 = vmatpush3.bf16.msra.mxu0 %v609_v24  ;;  %v683_v59 = vpack.c.bf16 %v120_v54, %v119_v53  ;;  %v107_v60 = vld [vmem:[%s1100_s1 + $0x2b0] sm:$0xff]  ;;  %v108_v61 = vld [vmem:[%s1100_s1 + $0x2b8] sm:$0xff]  ;;  %v121_v62 = vld [vmem:[%s1100_s1 + $0x320] sm:$0xff]  ;;  %v657_v2 = vpack.c.bf16 %v90_v58, %v89_v56 }
  0x1e   :  { %612 = vmatprep.subr.bf16.mxu0 %v611_v26  ;;  %v122_v63 = vld [vmem:[%s1100_s1 + $0x328] sm:$0xff]  ;;  %v659_v3 = vpack.c.bf16 %v108_v61, %v107_v60  ;;  %v91_v4 = vld [vmem:[%s1100_s1 + $0x230] sm:$0xff]  ;;  %v92_v5 = vld [vmem:[%s1100_s1 + $0x238] sm:$0xff] }
  0x1f   :  { %642 = vmatpush3.bf16.msra.mxu1 %v641_v25  ;;  %v19_v0 = vld [vmem:[%s1101_s0 + $0x28] sm:$0xff]  ;;  %v686_v6 = vpack.c.bf16 %v122_v63, %v121_v62  ;;  %v109_v7 = vld [vmem:[%s1100_s1 + $0x2c0] sm:$0xff]  ;;  %v123_v9 = vld [vmem:[%s1100_s1 + $0x330] sm:$0xff]  ;;  %v661_v11 = vpack.c.bf16 %v92_v5, %v91_v4 }
  0x20   :  { %644 = vmatprep.subr.bf16.mxu1 %v643_v30  ;;  %v110_v8 = vld [vmem:[%s1100_s1 + $0x2c8] sm:$0xff]  ;;  %v124_v10 = vld [vmem:[%s1100_s1 + $0x338] sm:$0xff]  ;;  %v93_v13 = vld [vmem:[%s1100_s1 + $0x240] sm:$0xff] }
  0x21   :  { %614 = vmatpush3.bf16.msra.mxu0 %v613_v34  ;;  %v663_v12 = vpack.c.bf16 %v110_v8, %v109_v7  ;;  %v94_v14 = vld [vmem:[%s1100_s1 + $0x248] sm:$0xff]  ;;  %v689_v15 = vpack.c.bf16 %v124_v10, %v123_v9  ;;  %v111_v16 = vld [vmem:[%s1100_s1 + $0x2d0] sm:$0xff]  ;;  %v112_v17 = vld [vmem:[%s1100_s1 + $0x2d8] sm:$0xff] }
  0x22   :  { %648 = vmatprep.subr.bf16.mxu0 %v647_v36  ;;  %v125_v18 = vld [vmem:[%s1100_s1 + $0x340] sm:$0xff]  ;;  %v126_v19 = vld [vmem:[%s1100_s1 + $0x348] sm:$0xff]  ;;  %v665_v20 = vpack.c.bf16 %v94_v14, %v93_v13  ;;  %v667_v21 = vpack.c.bf16 %v112_v17, %v111_v16  ;;  %v95_v22 = vld [vmem:[%s1100_s1 + $0x250] sm:$0xff] }
  0x23   :  { %646 = vmatpush3.bf16.msra.mxu1 %v645_v35  ;;  %v96_v23 = vld [vmem:[%s1100_s1 + $0x258] sm:$0xff]  ;;  %v692_v24 = vpack.c.bf16 %v126_v19, %v125_v18  ;;  %v113_v25 = vld [vmem:[%s1100_s1 + $0x2e0] sm:$0xff]  ;;  %v114_v26 = vld [vmem:[%s1100_s1 + $0x2e8] sm:$0xff] }
  0x24   :  { %679 = vmatprep.subr.bf16.mxu1 %v706_v51  ;;  %205 = vmatmul.mubr.f32.vlgmr.msra.gmra.mrb[0].mxu0 %v14_v43  ;;  %v127_v27 = vld [vmem:[%s1100_s1 + $0x350] sm:$0xff]  ;;  %v128_v28 = vld [vmem:[%s1100_s1 + $0x358] sm:$0xff]  ;;  %v669_v29 = vpack.c.bf16 %v96_v23, %v95_v22  ;;  %v671_v30 = vpack.c.bf16 %v114_v26, %v113_v25  ;;  %v97_v31 = vld [vmem:[%s1100_s1 + $0x260] sm:$0xff] }
  0x25   :  { %650 = vmatpush3.bf16.msra.mxu0 %v649_v44  ;;  %344 = vmatprep.mubr.f32.mxu0 %v19_v0  ;;  %v98_v32 = vld [vmem:[%s1100_s1 + $0x268] sm:$0xff]  ;;  %v695_v33 = vpack.c.bf16 %v128_v28, %v127_v27  ;;  %v115_v34 = vld [vmem:[%s1100_s1 + $0x2f0] sm:$0xff]  ;;  %v116_v35 = vld [vmem:[%s1100_s1 + $0x2f8] sm:$0xff] }
  0x26   :  { %275 = vmatmul.mubr.f32.vlgmr.msra.gmra.mrb[0].mxu1 %v16_v45  ;;  %652 = vmatprep.subr.bf16.mxu0 %v651_v46  ;;  %v129_v36 = vld [vmem:[%s1100_s1 + $0x360] sm:$0xff]  ;;  %v130_v37 = vld [vmem:[%s1100_s1 + $0x368] sm:$0xff]  ;;  %v673_v38 = vpack.c.bf16 %v98_v32, %v97_v31  ;;  %v675_v39 = vpack.c.bf16 %v116_v35, %v115_v34  ;;  %v99_v40 = vld [vmem:[%s1100_s1 + $0x270] sm:$0xff] }
  0x27   :  { %681 = vmatpush3.bf16.msra.mxu1 %v680_v49  ;;  %580 = vmatprep.mubr.msk.f32.mxu1 %vm707_vm0, %v708_v1  ;;  %v100_v41 = vld [vmem:[%s1100_s1 + $0x278] sm:$0xff]  ;;  %v698_v42 = vpack.c.bf16 %v130_v37, %v129_v36  ;;  %v131_v43 = vld [vmem:[%s1100_s1 + $0x370] sm:$0xff]  ;;  %v18_v47 = vld [vmem:[%s1101_s0 + $0x20] sm:$0xff] }
  0x28   :  { %682 = vmatprep.subr.bf16.mxu1 %v706_v51  ;;  %v132_v44 = vld [vmem:[%s1100_s1 + $0x378] sm:$0xff]  ;;  %v677_v45 = vpack.c.bf16 %v100_v41, %v99_v40  ;;  %v20_v48 = vld [vmem:[%s1101_s0 + $0x30] sm:$0xff]  ;;  %v425_v50 = vld [vmem:[%s1102_s2] ss:$0 sm:$0xff] }
  0x29   :  { %654 = vmatpush3.bf16.msra.mxu0 %v653_v55  ;;  %v701_v46 = vpack.c.bf16 %v132_v44, %v131_v43 }
  0x2a   :  { %656 = vmatprep.subr.bf16.mxu0 %v655_v57 }
  0x2b   :  { %684 = vmatpush3.bf16.msra.mxu1 %v683_v59 }
  0x2c   :  { %685 = vmatprep.subr.bf16.mxu1 %v706_v51 }
  0x2d   :  { %658 = vmatpush3.bf16.msra.mxu0 %v657_v2 }
  0x2e   :  { %660 = vmatprep.subr.bf16.mxu0 %v659_v3 }
  0x2f   :  { %687 = vmatpush3.bf16.msra.mxu1 %v686_v6 }
  0x30   :  { %688 = vmatprep.subr.bf16.mxu1 %v706_v51 }
  0x31   :  { %662 = vmatpush3.bf16.msra.mxu0 %v661_v11 }
  0x32   :  { %664 = vmatprep.subr.bf16.mxu0 %v663_v12 }
  0x33   :  { %690 = vmatpush3.bf16.msra.mxu1 %v689_v15 }
  0x34   :  { %691 = vmatprep.subr.bf16.mxu1 %v706_v51 }
  0x35   :  { %666 = vmatpush3.bf16.msra.mxu0 %v665_v20 }
  0x36   :  { %668 = vmatprep.subr.bf16.mxu0 %v667_v21 }
  0x37   :  { %693 = vmatpush3.bf16.msra.mxu1 %v692_v24 }
  0x38   :  { %694 = vmatprep.subr.bf16.mxu1 %v706_v51 }
  0x39   :  { %670 = vmatpush3.bf16.msra.mxu0 %v669_v29 }
  0x3a   :  { %672 = vmatprep.subr.bf16.mxu0 %v671_v30 }
  0x3b   :  { %696 = vmatpush3.bf16.msra.mxu1 %v695_v33 }
  0x3c   :  { %697 = vmatprep.subr.bf16.mxu1 %v706_v51 }
  0x3d   :  { %674 = vmatpush3.bf16.msra.mxu0 %v673_v38 }
  0x3e   :  { %676 = vmatprep.subr.bf16.mxu0 %v675_v39 }
  0x3f   :  { %699 = vmatpush3.bf16.msra.mxu1 %v698_v42 }
  0x40   :  { %700 = vmatprep.subr.bf16.mxu1 %v706_v51 }
  0x41   :  { %678 = vmatpush3.bf16.msra.mxu0 %v677_v45 }
  0x43   :  { %702 = vmatpush3.bf16.msra.mxu1 %v701_v46 }
  0x44   :  { %345 = vmatmul.mubr.f32.vlgmr.msra.gmra.mrb[2].mxu0 %v18_v47 }
  0x46   :  { %581 = vmatmul.mubr.f32.vlgmr.msra.gmra.mrb[2].mxu1 %v20_v48 }
  0xf7   :  { %v458_v49 = vpop.f32.mrb[0].mxu0 }
  0xf8   :  { %v459_v52 = vpop.f32.mrb[1].mxu0 }
  0xf9   :  { %v493_v53 = vpop.f32.mrb[0].mxu1  ;;  %v460_v51 = vadd.f32 %v459_v52, %v458_v49 }
  0xfa   :  { %v494_v54 = vpop.f32.mrb[1].mxu1 }
  0xfb   :  { %v495_v55 = vadd.f32 %v494_v54, %v493_v53  ;;  %v207_v56 = vadd.f32 %v460_v51, %v425_v50 }
  0xfd   :  { %v277_v57 = vadd.f32 %v495_v55, %v207_v56 }
 0x117   :  { %v528_v58 = vpop.f32.mrb[2].mxu0 }
 0x118   :  { %v529_v59 = vpop.f32.mrb[3].mxu0 }
 0x119   :  { %v416_v60 = vpop.f32.mrb[2].mxu1  ;;  %v530_v61 = vadd.f32 %v529_v59, %v528_v58 }
 0x11a   :  { %v582_v62 = vpop.f32.mrb[3].mxu1 }
 0x11b   :  { %v347_v63 = vadd.f32 %v530_v61, %v277_v57 }
 0x11d   :  { %v417_v0 = vadd.f32 %v416_v60, %v347_v63 }
 0x11f   :  { %420 = vst [vmem:[%s1103_s3] sm:$0xff] %v417_v0 }

</bundles_post_ra>
